<compile_context>
chip_gen: v6e
topology: v6e:2x2x1
jax: 0.10.0
libtpu: 0.0.40
codegen_flags: <defaults>
</compile_context>

<pallas_src>
import jax
import jax.numpy as jnp
from jax.experimental import pallas as pl
from jax.experimental.pallas import tpu as pltpu

C_IN = 64
C_OUT = 64
KH = KW = 3
NEG_SLOPE = 0.01  # torch.nn.LeakyReLU default


def _round_up(x, m):
    return ((x + m - 1) // m) * m


def _pick_row_tile(H, W):
    """Output rows per grid step.

    A multiple-of-8 (sublane) divisor of H, sized so per-step matmul intermediates
    stay ~2 MB (bounds vreg/VMEM pressure; v7x only has 64 MiB physical VMEM) while
    keeping >= 2 row tiles when H allows (restores double-buffering and v7x
    megacore balance even at small batch).
    """
    wp = _round_up(W + 2, 8)
    bytes_per_row = (2 * wp * KH * C_IN + W * C_OUT) * 4  # x3 + matmul out + acc (f32)
    cap = max(8, (2 * 1024 * 1024) // bytes_per_row)
    cap = min(cap, max(8, H // 2))          # prefer >= 2 row tiles when H >= 16
    best = 0
    for th in range(8, min(H, cap) + 1, 8):
        if H % th == 0:
            best = th
    return best if best else H              # fallback: whole image in one tile


def _conv_lrelu_kernel(x_ref, w_ref, b_ref, o_ref):
    """One (image, row-tile) per grid step.

    x_ref : (H+2, Wp, C_IN)    zero-padded NHWC image (Wp = W+2 rounded up to 8);
                               resident across the row-tile axis (index map ignores t)
    w_ref : (3*C_IN, 3*C_OUT)  rows = (kh, c_in), cols = (kw, c_out)
    b_ref : (1, C_OUT)         bias
    o_ref : (TH, W*C_OUT)      lane-dense output row tile
    """
    TH = o_ref.shape[0]
    W = o_ref.shape[1] // C_OUT

    r0 = pl.program_id(1) * TH                      # first padded row of this tile
    xt = x_ref[pl.ds(r0, TH + 2)]                   # (TH+2, Wp, C_IN), contiguous rows

    # Stack the 3 kh taps along channels -> contraction dim K = 3*C_IN = 192.
    # Row slices are contiguous: no per-tap strided slice + reshape relayouts.
    x3 = jnp.concatenate([xt[kh:kh + TH] for kh in range(KH)], axis=-1)  # (TH, Wp, 3*C_IN)
    wp = x3.shape[1]

    lhs = x3.reshape(TH * wp, KH * C_IN).astype(w_ref.dtype)

    # Single fused matmul: K = 192 (fills v5e's 128-wide MXU; 75% of v6e/v7x's 256),
    # N = 192 (kw taps stacked along output columns), f32 accumulation on the MXU.
    y = jnp.dot(lhs, w_ref[...], preferred_element_type=jnp.float32)     # (TH*Wp, 3*C_OUT)
    y3 = y.reshape(TH, wp, KW * C_OUT)

    # Bias folded into the accumulator init; combine the kw taps by shifting the
    # matmul OUTPUT along the padded width (3 small adds) instead of re-slicing input.
    acc = jnp.broadcast_to(b_ref[...], (TH, W, C_OUT)).astype(jnp.float32)
    for kw in range(KW):
        acc = acc + y3[:, kw:kw + W, kw * C_OUT:(kw + 1) * C_OUT]

    acc = jnp.where(acc >= 0, acc, NEG_SLOPE * acc)                       # LeakyReLU(0.01)

    # Lane-dense store: last dim W*C_OUT (multiple of 128 for even W) -> unmasked vst.
    o_ref[...] = acc.reshape(o_ref.shape).astype(o_ref.dtype)


def conv_leakyrelu_block_nhwc(x_nhwc, weight_oihw, bias, *, row_tile=None, use_bf16=False):
    """NHWC forward pass: (N, H, W, 64) -> (N, H, W, 64)."""
    N, H, W, C = x_nhwc.shape
    assert C == C_IN

    Wp = _round_up(W + 2, 8)
    # padding=1 on both sides; extra right-pad columns (up to Wp) are never read
    # by any valid output position, they only keep the sublane dim a multiple of 8.
    x_pad = jnp.pad(x_nhwc, ((0, 0), (1, 1), (1, Wp - W - 1), (0, 0)))

    # OIHW -> (kh, c_in, kw, c_out) -> (3*C_IN, 3*C_OUT)
    w_stack = jnp.transpose(weight_oihw, (2, 1, 3, 0)).reshape(KH * C_IN, KW * C_OUT)
    if use_bf16:
        # bf16 MXU inputs, f32 accumulation (re-validate tolerances if enabled).
        w_stack = w_stack.astype(jnp.bfloat16)
    b2 = bias.reshape(1, C_OUT)

    TH = row_tile or _pick_row_tile(H, W)
    assert H % TH == 0
    grid = (N, H // TH)

    out = pl.pallas_call(
        _conv_lrelu_kernel,
        out_shape=jax.ShapeDtypeStruct((N, H, W * C_OUT), x_nhwc.dtype),
        grid=grid,
        in_specs=[
            # Full padded image per n; index map ignores t -> DMA'd once per image.
            pl.BlockSpec((None, H + 2, Wp, C_IN), lambda n, t: (n, 0, 0, 0)),
            pl.BlockSpec((KH * C_IN, KW * C_OUT), lambda n, t: (0, 0)),
            pl.BlockSpec((1, C_OUT), lambda n, t: (0, 0)),
        ],
        out_specs=pl.BlockSpec((None, TH, W * C_OUT), lambda n, t: (n, t, 0)),
        compiler_params=pltpu.CompilerParams(
            dimension_semantics=("parallel", "parallel"),   # batch x row-tiles (v7x megacore)
            vmem_limit_bytes=48 * 1024 * 1024,              # fits v7x's 64 MiB physical VMEM
        ),
    )(x_pad, w_stack, b2)

    return out.reshape(N, H, W, C_OUT)


def conv_leakyrelu_block(x_nchw, weight_oihw, bias, **kwargs):
    """PyTorch-parity wrapper (NCHW in / NCHW out).

    If the surrounding model is NHWC, call conv_leakyrelu_block_nhwc directly and
    skip both transposes (they are extra HBM passes over a memory-bound op).
    """
    N, C, H, W = x_nchw.shape
    assert C == C_IN
    x_nhwc = jnp.transpose(x_nchw, (0, 2, 3, 1))
    out_nhwc = conv_leakyrelu_block_nhwc(x_nhwc, weight_oihw, bias, **kwargs)
    return jnp.transpose(out_nhwc, (0, 3, 1, 2))


def _reference(x_nchw, weight_oihw, bias):
    """Pure-JAX reference (lax conv) for correctness checking."""
    y = jax.lax.conv_general_dilated(
        x_nchw, weight_oihw,
        window_strides=(1, 1), padding=((1, 1), (1, 1)),
        dimension_numbers=("NCHW", "OIHW", "NCHW"))
    y = y + bias.reshape(1, C_OUT, 1, 1)
    return jnp.where(y >= 0, y, NEG_SLOPE * y)


if __name__ == "__main__":
    key = jax.random.PRNGKey(0)
    kx, kw_, kb = jax.random.split(key, 3)

    N, H, W = 2, 16, 16
    x = jax.random.normal(kx, (N, C_IN, H, W), jnp.float32)

    # Deterministic synthetic parameters (shapes from nn.Conv2d(64, 64, 3)).
    fan_in = C_IN * KH * KW
    bound = float(fan_in) ** -0.5
    weight = jax.random.uniform(kw_, (C_OUT, C_IN, KH, KW), jnp.float32,
                                minval=-bound, maxval=bound)
    bias = jax.random.uniform(kb, (C_OUT,), jnp.float32,
                              minval=-bound, maxval=bound)

    fwd = jax.jit(conv_leakyrelu_block)
    out = jax.block_until_ready(fwd(x, weight, bias))

    ref = jax.block_until_ready(_reference(x, weight, bias))
    assert out.shape == (N, C_OUT, H, W)
    assert jnp.allclose(out, ref, atol=1e-4, rtol=1e-4), "mismatch vs reference"

    print("KERNEL_OK")
</pallas_src>

<mosaic_0001>
module attributes {stable_mosaic.version = 11 : i64} {
  func.func @_conv_lrelu_kernel(%arg0: i32, %arg1: i32, %arg2: memref<1x18x24x64xf32, #tpu.memory_space<vmem>>, %arg3: memref<192x192xf32, #tpu.memory_space<vmem>>, %arg4: memref<1x64xf32, #tpu.memory_space<vmem>>, %arg5: memref<1x8x1024xf32, #tpu.memory_space<vmem>>) attributes {dimension_semantics = [#tpu.dimension_semantics<parallel>, #tpu.dimension_semantics<parallel>], iteration_bounds = array<i64: 2, 2>, scalar_prefetch = 0 : i64, scratch_operands = 0 : i64, tpu.core_type = #tpu.core_type<tc>, window_params = [{transform_indices = @transform_0, window_bounds = array<i64: 1, 18, 24, 64>}, {pipeline_mode = #tpu.pipeline_mode<synchronous>, transform_indices = @transform_1, window_bounds = array<i64: 192, 192>}, {pipeline_mode = #tpu.pipeline_mode<synchronous>, transform_indices = @transform_2, window_bounds = array<i64: 1, 64>}, {transform_indices = @transform_3, window_bounds = array<i64: 1, 8, 1024>}]} {
    %c8_i32 = arith.constant 8 : i32
    %0 = arith.muli %arg1, %c8_i32 : i32
    %c0 = arith.constant 0 : index
    %1 = arith.index_cast %0 : i32 to index
    %c0_0 = arith.constant 0 : index
    %c0_1 = arith.constant 0 : index
    %2 = vector.load %arg2[%c0, %1, %c0_0, %c0_1] : memref<1x18x24x64xf32, #tpu.memory_space<vmem>>, vector<1x10x24x64xf32>
    %3 = vector.shape_cast %2 : vector<1x10x24x64xf32> to vector<10x24x64xf32>
    %4 = vector.extract_strided_slice %3 {offsets = [0, 0, 0], sizes = [8, 24, 64], strides = [1, 1, 1]} : vector<10x24x64xf32> to vector<8x24x64xf32>
    %5 = vector.extract_strided_slice %3 {offsets = [1, 0, 0], sizes = [8, 24, 64], strides = [1, 1, 1]} : vector<10x24x64xf32> to vector<8x24x64xf32>
    %6 = vector.extract_strided_slice %3 {offsets = [2, 0, 0], sizes = [8, 24, 64], strides = [1, 1, 1]} : vector<10x24x64xf32> to vector<8x24x64xf32>
    %7 = tpu.concatenate %4, %5, %6 in 2 : vector<8x24x64xf32>, vector<8x24x64xf32>, vector<8x24x64xf32> -> vector<8x24x192xf32>
    %8 = vector.shape_cast %7 : vector<8x24x192xf32> to vector<192x192xf32>
    %c0_2 = arith.constant 0 : index
    %c0_3 = arith.constant 0 : index
    %9 = vector.load %arg3[%c0_2, %c0_3] : memref<192x192xf32, #tpu.memory_space<vmem>>, vector<192x192xf32>
    %cst = arith.constant dense<0.000000e+00> : vector<192x192xf32>
    %10 = tpu.matmul %8, %9, %cst {dimension_numbers = #tpu.dot_dimension_numbers<[1], [0], [0], [1], [0, 0, 1, 1], [], []>} : vector<192x192xf32>, vector<192x192xf32>, vector<192x192xf32> -> vector<192x192xf32>
    %11 = vector.shape_cast %10 : vector<192x192xf32> to vector<8x24x192xf32>
    %c0_4 = arith.constant 0 : index
    %c0_5 = arith.constant 0 : index
    %12 = vector.load %arg4[%c0_4, %c0_5] : memref<1x64xf32, #tpu.memory_space<vmem>>, vector<1x64xf32>
    %13 = vector.shape_cast %12 : vector<1x64xf32> to vector<1x1x64xf32>
    %14 = vector.broadcast %13 : vector<1x1x64xf32> to vector<8x16x64xf32>
    %15 = vector.extract_strided_slice %11 {offsets = [0, 0, 0], sizes = [8, 16, 64], strides = [1, 1, 1]} : vector<8x24x192xf32> to vector<8x16x64xf32>
    %16 = arith.addf %14, %15 : vector<8x16x64xf32>
    %17 = vector.extract_strided_slice %11 {offsets = [0, 1, 64], sizes = [8, 16, 64], strides = [1, 1, 1]} : vector<8x24x192xf32> to vector<8x16x64xf32>
    %18 = arith.addf %16, %17 : vector<8x16x64xf32>
    %19 = vector.extract_strided_slice %11 {offsets = [0, 2, 128], sizes = [8, 16, 64], strides = [1, 1, 1]} : vector<8x24x192xf32> to vector<8x16x64xf32>
    %20 = arith.addf %18, %19 : vector<8x16x64xf32>
    %cst_6 = arith.constant 0.000000e+00 : f32
    %21 = vector.broadcast %cst_6 : f32 to vector<8x16x64xf32>
    %22 = arith.cmpf oge, %20, %21 : vector<8x16x64xf32>
    %cst_7 = arith.constant 0.00999999977 : f32
    %23 = vector.broadcast %cst_7 : f32 to vector<8x16x64xf32>
    %24 = arith.mulf %23, %20 : vector<8x16x64xf32>
    %25 = arith.select %22, %20, %24 : vector<8x16x64xi1>, vector<8x16x64xf32>
    %26 = vector.shape_cast %25 : vector<8x16x64xf32> to vector<8x1024xf32>
    %c0_8 = arith.constant 0 : index
    %c0_9 = arith.constant 0 : index
    %c0_10 = arith.constant 0 : index
    %27 = vector.load %arg5[%c0_8, %c0_9, %c0_10] : memref<1x8x1024xf32, #tpu.memory_space<vmem>>, vector<1x8x1024xf32>
    %28 = vector.shape_cast %27 : vector<1x8x1024xf32> to vector<8x1024xf32>
    %29 = vector.shape_cast %26 : vector<8x1024xf32> to vector<1x8x1024xf32>
    tpu.vector_store %arg5[%c0_8, %c0_9, %c0_10], %29 {strides = array<i32>} : memref<1x8x1024xf32, #tpu.memory_space<vmem>>, vector<1x8x1024xf32>,
    return
  }
  func.func @transform_0(%arg0: i32, %arg1: i32) -> (i32, i32, i32, i32) {
    %c0_i32 = arith.constant 0 : i32
    %c0_i32_0 = arith.constant 0 : i32
    %c0_i32_1 = arith.constant 0 : i32
    %c0_i32_2 = arith.constant 0 : i32
    return %arg0, %c0_i32, %c0_i32_0, %c0_i32_1 : i32, i32, i32, i32
  }
  func.func @transform_1(%arg0: i32, %arg1: i32) -> (i32, i32) {
    %c0_i32 = arith.constant 0 : i32
    %c0_i32_0 = arith.constant 0 : i32
    %c0_i32_1 = arith.constant 0 : i32
    return %c0_i32, %c0_i32_0 : i32, i32
  }
  func.func @transform_2(%arg0: i32, %arg1: i32) -> (i32, i32) {
    %c0_i32 = arith.constant 0 : i32
    %c0_i32_0 = arith.constant 0 : i32
    %c0_i32_1 = arith.constant 0 : i32
    return %c0_i32, %c0_i32_0 : i32, i32
  }
  func.func @transform_3(%arg0: i32, %arg1: i32) -> (i32, i32, i32) {
    %c0_i32 = arith.constant 0 : i32
    %c0_i32_0 = arith.constant 0 : i32
    return %arg0, %arg1, %c0_i32 : i32, i32, i32
  }
}

</mosaic_0001>

<bundles_post_ra>
// kernel: conv_leakyrelu_block.1
= control target key start
LH: loop header
LB: loop body
LE: loop exit
PB: predicated region body
PF: predicated region fallthrough
CT: control target
= control target key end

     0   :  { %s1613_s12 = smov 0   ;;  %s1615_s13 = smov 0   ;;  %s2330_s0 = inlined_call_operand.vmem [shape: f32[2,18,24,64], index: 0, kind: input, shape index: {}]   ;;  %s2331_s1 = inlined_call_operand.vmem [shape: f32[192,192], index: 1, kind: input, shape index: {}]   ;;  %s2332_s2 = inlined_call_operand.vmem [shape: f32[1,64], index: 2, kind: input, shape index: {}]   ;;  %s2333_s3 = inlined_call_operand.vmem [shape: f32[2,16,1024], index: 3, kind: output, shape index: {}]  }
   0x1   :  { %s1617_s14 = smov 0   ;;  %s1619_s15 = smov 0  }
   0x2   :  { %s1621_s16 = smov 0  }
   0x3 LB: > { %s22_s17 = sadd.s32 1, %s1580_s14  ;;  %s25_s18 = sadd.s32 1, %s1584_s15  ;;  %s1588_s16 = sphi %s1621_s16, %s13_s16   ;;  %s1584_s15 = sphi %s1619_s15, %s2337_s15   ;;  %s1580_s14 = sphi %s1617_s14, %s2336_s14   ;;  %s1576_s13 = sphi %s1615_s13, %s2335_s13   ;;  %s1572_s12 = sphi %s1613_s12, %s2334_s12  }
   0x4   : > { %p23_p0 = scmp.ge.s32.totalorder %s22_s17, 2  ;;  %p1364_p1 = scmp.ge.s32.totalorder %s1588_s16, 1 }
   0x5   : > { %p151_p2 = scmp.lt.s32.totalorder %s1588_s16, 5 }
   0x6   : > { %s2339_s17 = smov (%p23_p0, %s22_s17), 0  ;;  %s2341_s18 = smov (!%p23_p0, %s25_s18), %s1584_s15 }
   0x7   : > { %p152_p3 = pnand %p1364_p1, %p151_p2  ;;  %p27_p4 = scmp.ge.s32.totalorder %s2341_s18, 2 }
   0x8   : > { %p179_p5 = scmp.lt.s32.totalorder (!%p152_p3), %s1576_s13, 1  ;;  %s1370_s29 = smul.u32 (!%p152_p3), 192, %s1572_s12 }
   0x9   : > { %s2343_s18 = smov (%p27_p4, %s2341_s18), 0  ;;  %155 = sbr.rel (%p152_p3) target bundleno = 645 (0x285), region = 32 }
   0xa   : > { %p186_p6 = scmp.lt.s32.totalorder (!%p152_p3), %s1572_s12, 1 }
   0xe   : > { %v378_v0 = vld [vmem:[%s2331_s1 + $0xf8] sm:$0xff]  ;;  %v377_v1 = vld [vmem:[%s2331_s1 + $0xf0] sm:$0xff]  ;;  %v376_v2 = vld [vmem:[%s2331_s1 + $0xe8] sm:$0xff]  ;;  %s2345_s13 = smov (!%p179_p5, %s1576_s13), 1  ;;  %vm322_vm0 = vcmask 523264   ;;  %vm702_vm1 = vcmask 1046528  }
   0xf   : > { %446 = vmatprep.subr.mxu0 %v378_v0  ;;  %1398 = vmatprep.subr.mxu1 %v378_v0  ;;  %v375_v3 = vld [vmem:[%s2331_s1 + $0xe0] sm:$0xff]  ;;  %v374_v4 = vld [vmem:[%s2331_s1 + $0xd8] sm:$0xff]  ;;  %v373_v5 = vld [vmem:[%s2331_s1 + $0xd0] sm:$0xff]  ;;  %s1446_s5 = smul.u32 432, %s2345_s13  ;;  %vm831_vm2 = vcmask 1045504   ;;  %s2347_s12 = smov (!%p186_p6, %s1572_s12), 1 }
  0x10   : > { %447 = vmatpush1.msra.mxu0 %v377_v1  ;;  %1422 = vmatpush1.msra.mxu1 %v377_v1  ;;  %v372_v6 = vld [vmem:[%s2331_s1 + $0xc8] sm:$0xff]  ;;  %v371_v7 = vld [vmem:[%s2331_s1 + $0xc0] sm:$0xff]  ;;  %v370_v8 = vld [vmem:[%s2331_s1 + $0xb8] sm:$0xff]  ;;  %s1366_s4 = sshll.u32 %s2347_s12, 3 }
  0x11   : > { %448 = vmatprep.subr.mxu0 %v376_v2  ;;  %1399 = vmatprep.subr.mxu1 %v376_v2  ;;  %s183_s19 = scalar_lea.vmem %s2330_s0, %s1446_s5  ;;  %v369_v9 = vld [vmem:[%s2331_s1 + $0xb0] sm:$0xff]  ;;  %v368_v10 = vld [vmem:[%s2331_s1 + $0xa8] sm:$0xff]  ;;  %v367_v21 = vld [vmem:[%s2331_s1 + $0xa0] sm:$0xff]  ;;  %s1367_s5 = sshll.u32 %s2345_s13, 4 }
  0x12   : > { %449 = vmatpush1.msra.mxu0 %v375_v3  ;;  %1423 = vmatpush1.msra.mxu1 %v375_v3  ;;  %s1679_s22 = scalar_lea.vmem %s183_s19, %s1370_s29  ;;  %s1590_s29 = smov 64   ;;  %v366_v23 = vld [vmem:[%s2331_s1 + $0x98] sm:$0xff]  ;;  %v365_v27 = vld [vmem:[%s2331_s1 + $0x90] sm:$0xff]  ;;  %v364_v30 = vld [vmem:[%s2331_s1 + $0x88] sm:$0xff] }
  0x13   : > { %450 = vmatprep.subr.mxu0 %v374_v4  ;;  %1400 = vmatprep.subr.mxu1 %v374_v4  ;;  %v1688_v11 = vld [vmem:[%s1679_s22 + $0x18] sm:$0xff]  ;;  %v1694_v13 = vld [vmem:[%s1679_s22 + $0x20] sm:$0xff]  ;;  %v1702_v16 = vld [vmem:[%s1679_s22 + $0x28] sm:$0xff]  ;;  %s190_s6 = sadd.s32 %s1367_s5, %s1366_s4 }
  0x14   : > { %451 = vmatpush1.msra.mxu0 %v373_v5  ;;  %1424 = vmatpush1.msra.mxu1 %v373_v5  ;;  %v1691_v12 = vld [vmem:[%s1679_s22 + $0x78] sm:$0xff]  ;;  %v1699_v15 = vld [vmem:[%s1679_s22 + $0x80] sm:$0xff]  ;;  %v1705_v17 = vld [vmem:[%s1679_s22 + $0x88] sm:$0xff]  ;;  %s1368_s7 = sshll.u32 %s190_s6, 3 }
  0x15   : > { %452 = vmatprep.subr.mxu0 %v372_v6  ;;  %1401 = vmatprep.subr.mxu1 %v372_v6  ;;  %v1490_v14 = vpack.i.bf16 %v1691_v12, %v1688_v11  ;;  %v1500_v18 = vpack.i.bf16 %v1705_v17, %v1702_v16  ;;  %v1710_v19 = vld [vmem:[%s1679_s22 + $0x30] sm:$0xff]  ;;  %v1495_v22 = vpack.i.bf16 %v1699_v15, %v1694_v13  ;;  %v1728_v25 = vld [vmem:[%s1679_s22 + $0x38] sm:$0xff]  ;;  %v1737_v28 = vld [vmem:[%s1679_s22 + $0x40] sm:$0xff]  ;;  %s192_s10 = scalar_lea.vmem %s2333_s3, %s1368_s7 }
  0x16   : > { %453 = vmatpush1.msra.mxu0 %v371_v7  ;;  %1425 = vmatpush1.msra.mxu1 %v371_v7  ;;  %v1713_v20 = vld [vmem:[%s1679_s22 + $0x90] sm:$0xff]  ;;  %v1731_v26 = vld [vmem:[%s1679_s22 + $0x98] sm:$0xff]  ;;  %v1740_v29 = vld [vmem:[%s1679_s22 + $0xa0] sm:$0xff] }
  0x17   : > { %454 = vmatprep.subr.mxu0 %v370_v8  ;;  %1402 = vmatprep.subr.mxu1 %v370_v8  ;;  %v1505_v24 = vpack.i.bf16 %v1713_v20, %v1710_v19  ;;  %v1510_v31 = vpack.i.bf16 %v1731_v26, %v1728_v25  ;;  %v363_v32 = vld [vmem:[%s2331_s1 + $0x80] sm:$0xff]  ;;  %v1515_v33 = vpack.i.bf16 %v1740_v29, %v1737_v28  ;;  %v1755_v34 = vld [vmem:[%s1679_s22 + $0x48] sm:$0xff]  ;;  %v362_v36 = vld [vmem:[%s2331_s1 + $0x78] sm:$0xff] }
  0x18   : > { %455 = vmatpush1.msra.mxu0 %v369_v9  ;;  %1426 = vmatpush1.msra.mxu1 %v369_v9  ;;  %v1758_v35 = vld [vmem:[%s1679_s22 + $0xa8] sm:$0xff]  ;;  %v1764_v37 = vld [vmem:[%s1679_s22 + $0x50] sm:$0xff]  ;;  %v1782_v43 = vld [vmem:[%s1679_s22 + $0x58] sm:$0xff] }
  0x19   : > { %1491 = vrot.lane.b32.xlu0 %v1490_v14, %s1590_s29  ;;  %456 = vmatprep.subr.mxu0 %v368_v10  ;;  %v1767_v38 = vld [vmem:[%s1679_s22 + $0xb0] sm:$0xff]  ;;  %v1520_v40 = vpack.i.bf16 %v1758_v35, %v1755_v34  ;;  %v360_v41 = vld [vmem:[%s2331_s1 + $0x68] sm:$0xff]  ;;  %v1785_v44 = vld [vmem:[%s1679_s22 + $0xb8] sm:$0xff] }
  0x1a   : > { %1501 = vrot.lane.b32.xlu1 %v1500_v18, %s1590_s29  ;;  %1403 = vmatprep.subr.mxu1 %v368_v10  ;;  %v361_v39 = vld [vmem:[%s2331_s1 + $0x70] sm:$0xff]  ;;  %v1525_v42 = vpack.i.bf16 %v1767_v38, %v1764_v37  ;;  %v359_v45 = vld [vmem:[%s2331_s1 + $0x60] sm:$0xff]  ;;  %v358_v48 = vld [vmem:[%s2331_s1 + $0x58] sm:$0xff]  ;;  %v1530_v49 = vpack.i.bf16 %v1785_v44, %v1782_v43 }
  0x1b   : > { %457 = vmatpush1.msra.mxu0 %v367_v21  ;;  %1427 = vmatpush1.msra.mxu1 %v367_v21  ;;  %v1791_v46 = vld [vmem:[%s1679_s22 + $0x60] sm:$0xff]  ;;  %v357_v50 = vld [vmem:[%s2331_s1 + $0x50] sm:$0xff]  ;;  %v1809_v52 = vld [vmem:[%s1679_s22 + $0x68] sm:$0xff] }
  0x1c   : > { %458 = vmatprep.subr.mxu0 %v366_v23  ;;  %1404 = vmatprep.subr.mxu1 %v366_v23  ;;  %v1794_v47 = vld [vmem:[%s1679_s22 + $0xc0] sm:$0xff]  ;;  %v1812_v53 = vld [vmem:[%s1679_s22 + $0xc8] sm:$0xff]  ;;  %v1818_v55 = vld [vmem:[%s1679_s22 + $0x70] sm:$0xff] }
  0x1d   : > { %1496 = vrot.lane.b32.xlu0 %v1495_v22, %s1590_s29  ;;  %459 = vmatpush1.msra.mxu0 %v365_v27  ;;  %v1535_v51 = vpack.i.bf16 %v1794_v47, %v1791_v46  ;;  %v356_v54 = vld [vmem:[%s2331_s1 + $0x48] sm:$0xff]  ;;  %v1821_v56 = vld [vmem:[%s1679_s22 + $0xd0] sm:$0xff]  ;;  %v355_v57 = vld [vmem:[%s2331_s1 + $0x40] sm:$0xff]  ;;  %v1540_v58 = vpack.i.bf16 %v1812_v53, %v1809_v52 }
  0x1e   : > { %1506 = vrot.lane.b32.xlu1 %v1505_v24, %s1590_s29  ;;  %1428 = vmatpush1.msra.mxu1 %v365_v27  ;;  %v354_v59 = vld [vmem:[%s2331_s1 + $0x38] sm:$0xff]  ;;  %v1545_v60 = vpack.i.bf16 %v1821_v56, %v1818_v55  ;;  %v353_v61 = vld [vmem:[%s2331_s1 + $0x30] sm:$0xff]  ;;  %v352_v62 = vld [vmem:[%s2331_s1 + $0x28] sm:$0xff] }
  0x1f   : > { %460 = vmatprep.subr.mxu0 %v364_v30  ;;  %1405 = vmatprep.subr.mxu1 %v364_v30  ;;  %v351_v63 = vld [vmem:[%s2331_s1 + $0x20] sm:$0xff]  ;;  %v350_v0 = vld [vmem:[%s2331_s1 + $0x18] sm:$0xff]  ;;  %v349_v1 = vld [vmem:[%s2331_s1 + $0x10] sm:$0xff] }
  0x20   : > { %461 = vmatpush1.msra.mxu0 %v363_v32  ;;  %1429 = vmatpush1.msra.mxu1 %v363_v32  ;;  %v348_v2 = vld [vmem:[%s2331_s1 + $0x8] sm:$0xff]  ;;  %v347_v3 = vld [vmem:[%s2331_s1] sm:$0xff]  ;;  %v394_v4 = vld [vmem:[%s2331_s1 + $0x178] sm:$0xff] }
  0x21   : > { %1511 = vrot.lane.b32.xlu0 %v1510_v31, %s1590_s29  ;;  %462 = vmatprep.subr.mxu0 %v362_v36  ;;  %v393_v5 = vld [vmem:[%s2331_s1 + $0x170] sm:$0xff]  ;;  %v392_v6 = vld [vmem:[%s2331_s1 + $0x168] sm:$0xff]  ;;  %v391_v7 = vld [vmem:[%s2331_s1 + $0x160] sm:$0xff] }
  0x22   : > { %1516 = vrot.lane.b32.xlu1 %v1515_v33, %s1590_s29  ;;  %1406 = vmatprep.subr.mxu1 %v362_v36  ;;  %v390_v8 = vld [vmem:[%s2331_s1 + $0x158] sm:$0xff]  ;;  %v389_v9 = vld [vmem:[%s2331_s1 + $0x150] sm:$0xff]  ;;  %v388_v10 = vld [vmem:[%s2331_s1 + $0x148] sm:$0xff] }
  0x23   : > { %463 = vmatpush1.msra.mxu0 %v361_v39  ;;  %1430 = vmatpush1.msra.mxu1 %v361_v39  ;;  %v387_v14 = vld [vmem:[%s2331_s1 + $0x140] sm:$0xff]  ;;  %v386_v18 = vld [vmem:[%s2331_s1 + $0x138] sm:$0xff]  ;;  %v385_v21 = vld [vmem:[%s2331_s1 + $0x130] sm:$0xff] }
  0x24   : > { %464 = vmatprep.subr.mxu0 %v360_v41  ;;  %1407 = vmatprep.subr.mxu1 %v360_v41  ;;  %v384_v22 = vld [vmem:[%s2331_s1 + $0x128] sm:$0xff]  ;;  %v383_v23 = vld [vmem:[%s2331_s1 + $0x120] sm:$0xff]  ;;  %v382_v24 = vld [vmem:[%s2331_s1 + $0x118] sm:$0xff] }
  0x25   : > { %1521 = vrot.lane.b32.xlu0 %v1520_v40, %s1590_s29  ;;  %465 = vmatpush1.msra.mxu0 %v359_v45  ;;  %v381_v27 = vld [vmem:[%s2331_s1 + $0x110] sm:$0xff]  ;;  %v380_v30 = vld [vmem:[%s2331_s1 + $0x108] sm:$0xff]  ;;  %v379_v31 = vld [vmem:[%s2331_s1 + $0x100] sm:$0xff] }
  0x26   : > { %1526 = vrot.lane.b32.xlu1 %v1525_v42, %s1590_s29  ;;  %1431 = vmatpush1.msra.mxu1 %v359_v45  ;;  %v196_v33 = vld [vmem:[%s1679_s22] sm:$0xff] }
  0x27   : > { %466 = vmatprep.subr.mxu0 %v358_v48  ;;  %1408 = vmatprep.subr.mxu1 %v358_v48  ;;  %v197_v48 = vld [vmem:[%s1679_s22 + $0x8] sm:$0xff] }
  0x28   : > { %467 = vmatpush1.msra.mxu0 %v357_v50  ;;  %1432 = vmatpush1.msra.mxu1 %v357_v50 }
  0x29   : > { %1531 = vrot.lane.b32.xlu0 %v1530_v49, %s1590_s29  ;;  %468 = vmatprep.subr.mxu0 %v356_v54 }
  0x2a   : > { %1536 = vrot.lane.b32.xlu1 %v1535_v51, %s1590_s29  ;;  %1409 = vmatprep.subr.mxu1 %v356_v54 }
  0x2b   : > { %469 = vmatpush1.msra.mxu0 %v355_v57  ;;  %1433 = vmatpush1.msra.mxu1 %v355_v57 }
  0x2c   : > { %470 = vmatprep.subr.mxu0 %v354_v59  ;;  %1410 = vmatprep.subr.mxu1 %v354_v59 }
  0x2d   : > { %1541 = vrot.lane.b32.xlu0 %v1540_v58, %s1590_s29  ;;  %471 = vmatpush1.msra.mxu0 %v353_v61  ;;  %v198_v58 = vld [vmem:[%s1679_s22 + $0x10] sm:$0xff] }
  0x2e   : > { %1546 = vrot.lane.b32.xlu1 %v1545_v60, %s1590_s29  ;;  %1434 = vmatpush1.msra.mxu1 %v353_v61 }
  0x2f   : > { %472 = vmatprep.subr.mxu0 %v352_v62  ;;  %1411 = vmatprep.subr.mxu1 %v352_v62 }
  0x30   : > { %473 = vmatpush1.msra.mxu0 %v351_v63  ;;  %1435 = vmatpush1.msra.mxu1 %v351_v63 }
  0x31   : > { %474 = vmatprep.subr.mxu0 %v350_v0  ;;  %1412 = vmatprep.subr.mxu1 %v350_v0 }
  0x32   : > { %475 = vmatpush1.msra.mxu0 %v349_v1  ;;  %1436 = vmatpush1.msra.mxu1 %v349_v1 }
  0x33   : > { %476 = vmatprep.subr.mxu0 %v348_v2  ;;  %1413 = vmatprep.subr.mxu1 %v348_v2 }
  0x34   : > { %477 = vmatpush1.msra.mxu0 %v347_v3  ;;  %1437 = vmatpush1.msra.mxu1 %v347_v3 }
  0x35   : > { %494 = vmatprep.subr.mxu0 %v394_v4  ;;  %1414 = vmatprep.subr.mxu1 %v394_v4 }
  0x36   : > { %495 = vmatpush2.msra.mxu0 %v393_v5  ;;  %1438 = vmatpush2.msra.mxu1 %v393_v5 }
  0x37   : > { %496 = vmatprep.subr.mxu0 %v392_v6  ;;  %1415 = vmatprep.subr.mxu1 %v392_v6 }
  0x38   : > { %497 = vmatpush2.msra.mxu0 %v391_v7  ;;  %1439 = vmatpush2.msra.mxu1 %v391_v7 }
  0x39   : > { %498 = vmatprep.subr.mxu0 %v390_v8  ;;  %1416 = vmatprep.subr.mxu1 %v390_v8 }
  0x3a   : > { %499 = vmatpush2.msra.mxu0 %v389_v9  ;;  %1440 = vmatpush2.msra.mxu1 %v389_v9 }
  0x3b   : > { %500 = vmatprep.subr.mxu0 %v388_v10  ;;  %1417 = vmatprep.subr.mxu1 %v388_v10 }
  0x3c   : > { %501 = vmatpush2.msra.mxu0 %v387_v14  ;;  %1441 = vmatpush2.msra.mxu1 %v387_v14 }
  0x3d   : > { %502 = vmatprep.subr.mxu0 %v386_v18  ;;  %1418 = vmatprep.subr.mxu1 %v386_v18 }
  0x3e   : > { %503 = vmatpush2.msra.mxu0 %v385_v21  ;;  %1442 = vmatpush2.msra.mxu1 %v385_v21 }
  0x3f   : > { %504 = vmatprep.subr.mxu0 %v384_v22  ;;  %1419 = vmatprep.subr.mxu1 %v384_v22 }
  0x40   : > { %505 = vmatpush2.msra.mxu0 %v383_v23  ;;  %1443 = vmatpush2.msra.mxu1 %v383_v23 }
  0x41   : > { %506 = vmatprep.subr.mxu0 %v382_v24  ;;  %1420 = vmatprep.subr.mxu1 %v382_v24 }
  0x42   : > { %507 = vmatpush2.msra.mxu0 %v381_v27  ;;  %1444 = vmatpush2.msra.mxu1 %v381_v27 }
  0x43   : > { %508 = vmatprep.subr.mxu0 %v380_v30  ;;  %1421 = vmatprep.subr.mxu1 %v380_v30 }
  0x44   : > { %509 = vmatpush2.msra.mxu0 %v379_v31  ;;  %1445 = vmatpush2.msra.mxu1 %v379_v31 }
  0x45   : > { %1371 = vmatprep.mubr.msk.f32.mxu0 %vm322_vm0, %v1710_v19  ;;  %1383 = vmatprep.mubr.msk.f32.mxu1 %vm322_vm0, %v1713_v20 }
  0x8b   : > { %v1492_v32 = vpop.permute.xlu0 %1491 }
  0x8c   : > { %v1494_v36 = vunpack.i.h.bf16 %v1492_v32  ;;  %v1493_v39 = vunpack.i.l.bf16 %v1492_v32  ;;  %v1502_v40 = vpop.permute.xlu1 %1501 }
  0x8d   : > { %v1504_v51 = vunpack.i.h.bf16 %v1502_v40  ;;  %v1503_v54 = vunpack.i.l.bf16 %v1502_v40 }
  0x8e   : > { %v323_v41 = vsel %vm322_vm0, %v196_v33, %v1493_v39  ;;  %v335_v42 = vsel %vm322_vm0, %v1791_v46, %v1494_v36  ;;  %v223_v33 = vld [vmem:[%s1679_s22 + $0xd8] sm:$0xff]  ;;  %v224_v39 = vld [vmem:[%s1679_s22 + $0xe0] sm:$0xff] }
  0x8f   : > { %v1497_v45 = vpop.permute.xlu0 %1496  ;;  %511 = vmatmul.mubr.f32.vlgmr.msra.gmra.mxu0 %v323_v41  ;;  %583 = vmatmul.mubr.f32.vlgmr.msra.gmra.mxu1 %v335_v42  ;;  %v325_v63 = vsel %vm322_vm0, %v198_v58, %v1503_v54  ;;  %v337_v0 = vsel %vm322_vm0, %v1818_v55, %v1504_v51  ;;  %v225_v42 = vld [vmem:[%s1679_s22 + $0xe8] sm:$0xff] }
  0x90   : > { %v1499_v49 = vunpack.i.h.bf16 %v1497_v45  ;;  %v1498_v50 = vunpack.i.l.bf16 %v1497_v45  ;;  %1372 = vmatprep.mubr.msk.f32.mxu0 %vm322_vm0, %v1728_v25  ;;  %1384 = vmatprep.mubr.msk.f32.mxu1 %vm322_vm0, %v1731_v26  ;;  %v1507_v57 = vpop.permute.xlu1 %1506 }
  0x91   : > { %v1509_v61 = vunpack.i.h.bf16 %v1507_v57  ;;  %v1508_v62 = vunpack.i.l.bf16 %v1507_v57 }
  0x92   : > { %v324_v59 = vsel %vm322_vm0, %v197_v48, %v1498_v50  ;;  %v336_v60 = vsel %vm322_vm0, %v1809_v52, %v1499_v49 }
  0x93   : > { %517 = vmatmul.mubr.f32.gmra.mxu0 %v324_v59  ;;  %589 = vmatmul.mubr.f32.gmra.mxu1 %v336_v60  ;;  %v1512_v1 = vpop.permute.xlu0 %1511  ;;  %v326_v4 = vsel %vm322_vm0, %v1688_v11, %v1508_v62  ;;  %v338_v5 = vsel %vm322_vm0, %v1691_v12, %v1509_v61 }
  0x94   : > { %1373 = vmatprep.mubr.msk.f32.mxu0 %vm322_vm0, %v1737_v28  ;;  %1385 = vmatprep.mubr.msk.f32.mxu1 %vm322_vm0, %v1740_v29  ;;  %v1514_v2 = vunpack.i.h.bf16 %v1512_v1  ;;  %v1513_v3 = vunpack.i.l.bf16 %v1512_v1  ;;  %v1517_v6 = vpop.permute.xlu1 %1516 }
  0x95   : > { %v1519_v7 = vunpack.i.h.bf16 %v1517_v6  ;;  %v1518_v8 = vunpack.i.l.bf16 %v1517_v6 }
  0x96   : > { %v327_v9 = vsel %vm322_vm0, %v1694_v13, %v1513_v3  ;;  %v339_v11 = vsel %vm322_vm0, %v1699_v15, %v1514_v2 }
  0x97   : > { %523 = vmatmul.mubr.f32.gmra.mxu0 %v325_v63  ;;  %595 = vmatmul.mubr.f32.gmra.mxu1 %v337_v0  ;;  %v1522_v10 = vpop.permute.xlu0 %1521  ;;  %v328_v21 = vsel %vm322_vm0, %v1702_v16, %v1518_v8  ;;  %v340_v13 = vsel %vm322_vm0, %v1705_v17, %v1519_v7 }
  0x98   : > { %1374 = vmatprep.mubr.msk.f32.mxu0 %vm322_vm0, %v1755_v34  ;;  %1386 = vmatprep.mubr.msk.f32.mxu1 %vm322_vm0, %v1758_v35  ;;  %v1524_v14 = vunpack.i.h.bf16 %v1522_v10  ;;  %v1523_v18 = vunpack.i.l.bf16 %v1522_v10  ;;  %v1527_v22 = vpop.permute.xlu1 %1526 }
  0x99   : > { %v1529_v23 = vunpack.i.h.bf16 %v1527_v22  ;;  %v1528_v24 = vunpack.i.l.bf16 %v1527_v22 }
  0x9a   : > { %v329_v27 = vsel %vm322_vm0, %v1710_v19, %v1523_v18  ;;  %v341_v16 = vsel %vm322_vm0, %v1713_v20, %v1524_v14 }
  0x9b   : > { %529 = vmatmul.mubr.f32.gmra.mxu0 %v326_v4  ;;  %601 = vmatmul.mubr.f32.gmra.mxu1 %v338_v5  ;;  %v1532_v30 = vpop.permute.xlu0 %1531  ;;  %v330_v31 = vsel %vm322_vm0, %v1728_v25, %v1528_v24  ;;  %v342_v19 = vsel %vm322_vm0, %v1731_v26, %v1529_v23 }
  0x9c   : > { %1375 = vmatprep.mubr.msk.f32.mxu0 %vm322_vm0, %v1764_v37  ;;  %1387 = vmatprep.mubr.msk.f32.mxu1 %vm322_vm0, %v1767_v38  ;;  %v1537_v32 = vpop.permute.xlu1 %1536 }
  0x9d   : > { %v1539_v20 = vunpack.i.h.bf16 %v1537_v32 }
  0x9f   : > { %535 = vmatmul.mubr.f32.gmra.mxu0 %v327_v9  ;;  %607 = vmatmul.mubr.f32.gmra.mxu1 %v339_v11  ;;  %v1542_v26 = vpop.permute.xlu0 %1541 }
  0xa0   : > { %1376 = vmatprep.mubr.msk.f32.mxu0 %vm322_vm0, %v1782_v43  ;;  %1388 = vmatprep.mubr.msk.f32.mxu1 %vm322_vm0, %v1785_v44 }
  0xa3   : > { %541 = vmatmul.mubr.f32.gmra.mxu0 %v328_v21  ;;  %613 = vmatmul.mubr.f32.gmra.mxu1 %v340_v13 }
  0xa4   : > { %1377 = vmatprep.mubr.msk.f32.mxu0 %vm322_vm0, %v1791_v46  ;;  %1389 = vmatprep.mubr.msk.f32.mxu1 %vm322_vm0, %v1794_v47  ;;  %v1534_v46 = vunpack.i.h.bf16 %v1532_v30  ;;  %v1533_v47 = vunpack.i.l.bf16 %v1532_v30 }
  0xa6   : > { %v343_v25 = vsel %vm322_vm0, %v1740_v29, %v1534_v46  ;;  %v1547_v29 = vpop.permute.xlu1 %1546 }
  0xa7   : > { %547 = vmatmul.mubr.f32.gmra.mxu0 %v329_v27  ;;  %619 = vmatmul.mubr.f32.gmra.mxu1 %v341_v16  ;;  %v1548_v40 = vunpack.i.l.bf16 %v1547_v29 }
  0xa8   : > { %1378 = vmatprep.mubr.msk.f32.mxu0 %vm322_vm0, %v1809_v52  ;;  %1390 = vmatprep.mubr.msk.f32.mxu1 %vm322_vm0, %v1812_v53  ;;  %v1538_v52 = vunpack.i.l.bf16 %v1537_v32  ;;  %v331_v53 = vsel %vm322_vm0, %v1737_v28, %v1533_v47  ;;  %v344_v28 = vsel %vm322_vm0, %v1758_v35, %v1539_v20 }
  0xaa   : > { %v332_v36 = vsel %vm322_vm0, %v1755_v34, %v1538_v52 }
  0xab   : > { %553 = vmatmul.mubr.f32.gmra.mxu0 %v330_v31  ;;  %625 = vmatmul.mubr.f32.gmra.mxu1 %v342_v19 }
  0xac   : > { %1379 = vmatprep.mubr.msk.f32.mxu0 %vm322_vm0, %v1818_v55  ;;  %1391 = vmatprep.mubr.msk.f32.mxu1 %vm322_vm0, %v1821_v56  ;;  %v1544_v55 = vunpack.i.h.bf16 %v1542_v26  ;;  %v1543_v56 = vunpack.i.l.bf16 %v1542_v26 }
  0xae   : > { %v333_v41 = vsel %vm322_vm0, %v1764_v37, %v1543_v56  ;;  %v345_v34 = vsel %vm322_vm0, %v1767_v38, %v1544_v55 }
  0xaf   : > { %559 = vmatmul.mubr.f32.gmra.mxu0 %v331_v53  ;;  %631 = vmatmul.mubr.f32.gmra.mxu1 %v343_v25 }
  0xb0   : > { %1380 = vmatprep.mubr.msk.f32.mxu0 %vm322_vm0, %v1691_v12  ;;  %1392 = vmatprep.mubr.msk.f32.mxu1 %vm322_vm0, %v223_v33  ;;  %v1549_v12 = vunpack.i.h.bf16 %v1547_v29 }
  0xb2   : > { %v346_v35 = vsel %vm322_vm0, %v1785_v44, %v1549_v12 }
  0xb3   : > { %565 = vmatmul.mubr.f32.gmra.mxu0 %v332_v36  ;;  %637 = vmatmul.mubr.f32.gmra.mxu1 %v344_v28 }
  0xb4   : > { %1381 = vmatprep.mubr.msk.f32.mxu0 %vm322_vm0, %v1699_v15  ;;  %1393 = vmatprep.mubr.msk.f32.mxu1 %vm322_vm0, %v224_v39  ;;  %v334_v15 = vsel %vm322_vm0, %v1782_v43, %v1548_v40 }
  0xb7   : > { %571 = vmatmul.mubr.f32.gmra.mxu0 %v333_v41  ;;  %643 = vmatmul.mubr.f32.gmra.mxu1 %v345_v34 }
  0xb8   : > { %1382 = vmatprep.mubr.msk.f32.mxu0 %vm322_vm0, %v1705_v17  ;;  %1394 = vmatprep.mubr.msk.f32.mxu1 %vm322_vm0, %v225_v42 }
  0xbb   : > { %577 = vmatmul.mubr.f32.gmra.mxu0 %v334_v15  ;;  %649 = vmatmul.mubr.f32.gmra.mxu1 %v346_v35 }
 0x14f   : > { %v2002_v37 = vpop.f32.mrf.mxu0  ;;  %v2004_v45 = vpop.f32.mrf.mxu1 }
 0x150   : > { %v703_v17 = vrot.slane %v2002_v37, 1  ;;  %v723_v62 = vrot.slane %v2004_v45, 1 }
 0x151   : > { %v514_v38 = vpop.f32.mrf.mxu0  ;;  %v586_v48 = vpop.f32.mrf.mxu1 }
 0x152   : > { %v832_v51 = vrot.slane %v514_v38, 2  ;;  %v852_v58 = vrot.slane %v586_v48, 2 }
 0x153   : > { %v2006_v49 = vpop.f32.mrf.mxu0  ;;  %v2008_v50 = vpop.f32.mrf.mxu1 }
 0x154   : > { %v704_v43 = vrot.slane %v2006_v49, 1  ;;  %v724_v44 = vrot.slane %v2008_v50, 1 }
 0x155   : > { %v520_v54 = vpop.f32.mrf.mxu0  ;;  %v592_v57 = vpop.f32.mrf.mxu1 }
 0x156   : > { %v833_v59 = vrot.slane %v520_v54, 2  ;;  %v853_v60 = vrot.slane %v592_v57, 2  ;;  %v705_v61 = vsel %vm702_vm1, %v703_v17, %v704_v43  ;;  %v725_v6 = vsel %vm702_vm1, %v723_v62, %v724_v44 }
 0x157   : > { %v596_v63 = vpop.f32.mrf.mxu1  ;;  %743 = vrot.lane.b32.xlu0 %v705_v61, %s1590_s29  ;;  %v524_v0 = vpop.f32.mrf.mxu0 }
 0x158   : > { %v706_v1 = vrot.slane %v524_v0, 1  ;;  %v2017_v2 = vsel %vm831_vm2, %v832_v51, %v833_v59  ;;  %v2020_v3 = vsel %vm831_vm2, %v852_v58, %v853_v60  ;;  %v726_v7 = vrot.slane %v596_v63, 1 }
 0x159   : > { %v526_v4 = vpop.f32.mrf.mxu0  ;;  %v598_v5 = vpop.f32.mrf.mxu1 }
 0x15a   : > { %v835_v8 = vrot.slane %v526_v4, 2  ;;  %v855_v9 = vrot.slane %v598_v5, 2  ;;  %v707_v11 = vsel %vm702_vm1, %v704_v43, %v706_v1  ;;  %v727_v23 = vsel %vm702_vm1, %v724_v44, %v726_v7 }
 0x15b   : > { %v2024_v10 = vpop.f32.mrf.mxu1  ;;  %759 = vrot.lane.b32.xlu0 %v725_v6, %s1590_s29  ;;  %745 = vrot.lane.b32.xlu1 %v707_v11, %s1590_s29  ;;  %v2028_v14 = vpop.f32.mrf.mxu0 }
 0x15c   : > { %v2031_v13 = vsel %vm831_vm2, %v833_v59, %v835_v8  ;;  %v2034_v22 = vsel %vm831_vm2, %v853_v60, %v855_v9  ;;  %v708_v16 = vrot.slane %v2028_v14, 1  ;;  %v728_v25 = vrot.slane %v2024_v10, 1 }
 0x15d   : > { %v532_v18 = vpop.f32.mrf.mxu0  ;;  %v604_v21 = vpop.f32.mrf.mxu1 }
 0x15e   : > { %v837_v46 = vrot.slane %v532_v18, 2  ;;  %v857_v32 = vrot.slane %v604_v21, 2 }
 0x15f   : > { %v2037_v24 = vpop.f32.mrf.mxu1  ;;  %761 = vrot.lane.b32.xlu1 %v727_v23, %s1590_s29  ;;  %v2040_v27 = vpop.f32.mrf.mxu0 }
 0x160   : > { %v709_v30 = vrot.slane %v2040_v27, 1  ;;  %v729_v47 = vrot.slane %v2037_v24, 1 }
 0x161   : > { %v538_v31 = vpop.f32.mrf.mxu0  ;;  %v610_v19 = vpop.f32.mrf.mxu1 }
 0x162   : > { %v838_v20 = vrot.slane %v538_v31, 2  ;;  %v858_v52 = vrot.slane %v610_v19, 2  ;;  %v710_v53 = vsel %vm702_vm1, %v708_v16, %v709_v30  ;;  %v730_v29 = vsel %vm702_vm1, %v728_v25, %v729_v47 }
 0x163   : > { %v614_v33 = vpop.f32.mrf.mxu1  ;;  %747 = vrot.lane.b32.xlu0 %v710_v53, %s1590_s29  ;;  %v542_v26 = vpop.f32.mrf.mxu0 }
 0x164   : > { %v711_v55 = vrot.slane %v542_v26, 1  ;;  %v2049_v56 = vsel %vm831_vm2, %v837_v46, %v838_v20  ;;  %v2052_v36 = vsel %vm831_vm2, %v857_v32, %v858_v52  ;;  %v731_v12 = vrot.slane %v614_v33, 1 }
 0x165   : > { %v544_v28 = vpop.f32.mrf.mxu0  ;;  %v616_v39 = vpop.f32.mrf.mxu1 }
 0x166   : > { %v840_v40 = vrot.slane %v544_v28, 2  ;;  %v860_v41 = vrot.slane %v616_v39, 2  ;;  %v712_v34 = vsel %vm702_vm1, %v709_v30, %v711_v55  ;;  %v732_v43 = vsel %vm702_vm1, %v729_v47, %v731_v12 }
 0x167   : > { %v2056_v42 = vpop.f32.mrf.mxu1  ;;  %763 = vrot.lane.b32.xlu0 %v730_v29, %s1590_s29  ;;  %749 = vrot.lane.b32.xlu1 %v712_v34, %s1590_s29  ;;  %v2060_v15 = vpop.f32.mrf.mxu0 }
 0x168   : > { %v2063_v48 = vsel %vm831_vm2, %v838_v20, %v840_v40  ;;  %v2066_v17 = vsel %vm831_vm2, %v858_v52, %v860_v41  ;;  %v713_v54 = vrot.slane %v2060_v15, 1  ;;  %v733_v4 = vrot.slane %v2056_v42, 1 }
 0x169   : > { %v550_v35 = vpop.f32.mrf.mxu0  ;;  %v622_v38 = vpop.f32.mrf.mxu1 }
 0x16a   : > { %v842_v58 = vrot.slane %v550_v35, 2  ;;  %v862_v62 = vrot.slane %v622_v38, 2 }
 0x16b   : > { %v2069_v51 = vpop.f32.mrf.mxu1  ;;  %765 = vrot.lane.b32.xlu1 %v732_v43, %s1590_s29  ;;  %v2072_v44 = vpop.f32.mrf.mxu0 }
 0x16c   : > { %v714_v57 = vrot.slane %v2072_v44, 1  ;;  %v734_v59 = vrot.slane %v2069_v51, 1 }
 0x16d   : > { %v556_v60 = vpop.f32.mrf.mxu0  ;;  %v628_v61 = vpop.f32.mrf.mxu1 }
 0x16e   : > { %v843_v63 = vrot.slane %v556_v60, 2  ;;  %v863_v0 = vrot.slane %v628_v61, 2  ;;  %v715_v1 = vsel %vm702_vm1, %v713_v54, %v714_v57  ;;  %v735_v21 = vsel %vm702_vm1, %v733_v4, %v734_v59 }
 0x16f   : > { %v632_v5 = vpop.f32.mrf.mxu1  ;;  %751 = vrot.lane.b32.xlu0 %v715_v1, %s1590_s29  ;;  %v560_v6 = vpop.f32.mrf.mxu0 }
 0x170   : > { %v716_v7 = vrot.slane %v560_v6, 1  ;;  %v2081_v8 = vsel %vm831_vm2, %v842_v58, %v843_v63  ;;  %v2084_v9 = vsel %vm831_vm2, %v862_v62, %v863_v0  ;;  %v736_v23 = vrot.slane %v632_v5, 1 }
 0x171   : > { %v562_v11 = vpop.f32.mrf.mxu0  ;;  %v634_v18 = vpop.f32.mrf.mxu1 }
 0x172   : > { %v845_v16 = vrot.slane %v562_v11, 2  ;;  %v865_v30 = vrot.slane %v634_v18, 2  ;;  %v717_v46 = vsel %vm702_vm1, %v714_v57, %v716_v7  ;;  %v737_v53 = vsel %vm702_vm1, %v734_v59, %v736_v23 }
 0x173   : > { %v2088_v47 = vpop.f32.mrf.mxu1  ;;  %767 = vrot.lane.b32.xlu0 %v735_v21, %s1590_s29  ;;  %753 = vrot.lane.b32.xlu1 %v717_v46, %s1590_s29  ;;  %v2092_v31 = vpop.f32.mrf.mxu0 }
 0x174   : > { %v2095_v20 = vsel %vm831_vm2, %v843_v63, %v845_v16  ;;  %v2098_v52 = vsel %vm831_vm2, %v863_v0, %v865_v30  ;;  %v718_v26 = vrot.slane %v2092_v31, 1  ;;  %v738_v54 = vrot.slane %v2088_v47, 1  ;;  %v1395_v0 = vld [vmem:[%s2332_s2] ss:$0 sm:$0xff] }
 0x175   : > { %v568_v19 = vpop.f32.mrf.mxu0  ;;  %v640_v32 = vpop.f32.mrf.mxu1  ;;  %v662_v1 = vadd.f32 %v1395_v0, %v2002_v37  ;;  %v670_v6 = vadd.f32 %v1395_v0, %v2004_v45  ;;  %v663_v7 = vadd.f32 %v1395_v0, %v2006_v49 }
 0x176   : > { %v847_v28 = vrot.slane %v568_v19, 2  ;;  %v867_v39 = vrot.slane %v640_v32, 2  ;;  %v671_v19 = vadd.f32 %v1395_v0, %v2008_v50 }
 0x177   : > { %v2101_v25 = vpop.f32.mrf.mxu1  ;;  %769 = vrot.lane.b32.xlu1 %v737_v53, %s1590_s29  ;;  %v2104_v33 = vpop.f32.mrf.mxu0  ;;  %v664_v53 = vadd.f32 %v1395_v0, %v2028_v14 }
 0x178   : > { %v719_v55 = vrot.slane %v2104_v33, 1  ;;  %v739_v40 = vrot.slane %v2101_v25, 1 }
 0x179   : > { %v2108_v29 = vpop.f32.mrf.mxu0  ;;  %v2110_v12 = vpop.f32.mrf.mxu1 }
 0x17a   : > { %v848_v41 = vrot.slane %v2108_v29, 2  ;;  %v868_v34 = vrot.slane %v2110_v12, 2  ;;  %v720_v35 = vsel %vm702_vm1, %v718_v26, %v719_v55  ;;  %v740_v61 = vsel %vm702_vm1, %v738_v54, %v739_v40 }
 0x17b   : > { %v650_v38 = vpop.f32.mrf.mxu1  ;;  %755 = vrot.lane.b32.xlu0 %v720_v35, %s1590_s29  ;;  %v578_v43 = vpop.f32.mrf.mxu0  ;;  %v672_v26 = vadd.f32 %v1395_v0, %v2024_v10  ;;  %v673_v10 = vadd.f32 %v1395_v0, %v2037_v24  ;;  %v667_v24 = vadd.f32 %v1395_v0, %v2072_v44 }
 0x17c   : > { %v721_v57 = vrot.slane %v578_v43, 1  ;;  %v2121_v58 = vsel %vm831_vm2, %v847_v28, %v848_v41  ;;  %v2126_v59 = vsel %vm831_vm2, %v867_v39, %v868_v34  ;;  %v741_v60 = vrot.slane %v650_v38, 1 }
 0x17d   : > { %v957_v38 = vlaneseq }
 0x17e   : > { %v722_v62 = vsel %vm702_vm1, %v719_v55, %v721_v57  ;;  %v742_v63 = vsel %vm702_vm1, %v739_v40, %v741_v60  ;;  %v665_v55 = vadd.f32 %v1395_v0, %v2040_v27  ;;  %v1591_v40 = vmov 1983009808  }
 0x17f   : > { %771 = vrot.lane.b32.xlu0 %v740_v61, %s1590_s29  ;;  %757 = vrot.lane.b32.xlu1 %v722_v62, %s1590_s29  ;;  %v955_v35 = vunpack.c.l.s4 %v1591_v40  ;;  %v2162_v54 = vshrl.u32 %v957_v38, 7  ;;  %v666_v57 = vadd.f32 %v1395_v0, %v2060_v15  ;;  %v674_v60 = vadd.f32 %v1395_v0, %v2056_v42 }
 0x180   : > { %v675_v61 = vadd.f32 %v1395_v0, %v2069_v51  ;;  %v668_v42 = vadd.f32 %v1395_v0, %v2092_v31 }
 0x181   : > { %v956_v27 = vunpack.c.0.s8 %v955_v35 }
 0x183   : > { %773 = vrot.lane.b32.xlu1 %v742_v63, %s1590_s29  ;;  %v1592_v63 = vmov 1934713408   ;;  %v2177_v15 = vsub.s32 %v956_v27, %v2162_v54 }
 0x1c9   : > { %v744_v4 = vpop.permute.xlu0 %743 }
 0x1ca   : > { %v791_v5 = vadd.f32 %v744_v4, %v662_v1  ;;  %v2174_v1 = vadd.f32 %v1395_v0, %v2088_v47  ;;  %v580_v4 = vpop.f32.mrf.mxu0  ;;  %v2184_v47 = vadd.f32 %v1395_v0, %v2101_v25 }
 0x1cc   : > { %v2141_v11 = vadd.f32 %v2017_v2, %v791_v5 }
 0x1cd   : > { %v760_v18 = vpop.permute.xlu0 %759  ;;  %v746_v21 = vpop.permute.xlu1 %745 }
 0x1ce   : > { %v799_v23 = vadd.f32 %v760_v18, %v670_v6  ;;  %v792_v16 = vadd.f32 %v746_v21, %v663_v7  ;;  %v920_v51 = vmul.f32 0.01, %v2141_v11  ;;  %v652_v7 = vpop.f32.mrf.mxu1  ;;  %vm904_vm3 = vcmp.ge.f32.partialorder %v2141_v11, 0.0 }
 0x1cf   : > { %v2187_v18 = vadd.f32 %v1395_v0, %v2104_v33  ;;  %v850_v21 = vrot.slane %v580_v4, 2 }
 0x1d0   : > { %v896_v30 = vadd.f32 %v2020_v3, %v799_v23  ;;  %v889_v46 = vadd.f32 %v2031_v13, %v792_v16 }
 0x1d1   : > { %v762_v37 = vpop.permute.xlu1 %761 }
 0x1d2   : > { %v800_v32 = vadd.f32 %v762_v37, %v671_v19  ;;  %v921_v6 = vmul.f32 0.01, %v889_v46  ;;  %vm912_vm4 = vcmp.ge.f32.partialorder %v896_v30, 0.0  ;;  %vm905_vm5 = vcmp.ge.f32.partialorder %v889_v46, 0.0 }
 0x1d4   : > { %v2148_v45 = vadd.f32 %v2034_v22, %v800_v32 }
 0x1d5   : > { %v748_v49 = vpop.permute.xlu0 %747 }
 0x1d6   : > { %v793_v2 = vadd.f32 %v748_v49, %v664_v53  ;;  %v870_v53 = vrot.slane %v652_v7, 2  ;;  %v936_v49 = vsel %vm904_vm3, %v2141_v11, %v920_v51  ;;  %vm913_vm7 = vcmp.ge.f32.partialorder %v2148_v45, 0.0 }
 0x1d8   : > { %v2153_v28 = vadd.f32 %v2049_v56, %v793_v2 }
 0x1d9   : > { %v764_v3 = vpop.permute.xlu0 %763  ;;  %v750_v13 = vpop.permute.xlu1 %749 }
 0x1da   : > { %v801_v39 = vadd.f32 %v764_v3, %v672_v26  ;;  %v794_v50 = vadd.f32 %v750_v13, %v665_v55  ;;  %v929_v26 = vmul.f32 0.01, %v2148_v45  ;;  %vm906_vm8 = vcmp.ge.f32.partialorder %v2153_v28, 0.0 }
 0x1dc   : > { %v2156_v14 = vadd.f32 %v2052_v36, %v801_v39  ;;  %v2159_v22 = vadd.f32 %v2063_v48, %v794_v50  ;;  %v2170_v48 = vunpack.c.l.s4 %v1592_v63  ;;  %v871_v63 = vsel %vm831_vm2, %v868_v34, %v870_v53 }
 0x1dd   : > { %v766_v43 = vpop.permute.xlu1 %765 }
 0x1de   : > { %v802_v56 = vadd.f32 %v766_v43, %v673_v10  ;;  %v1020_v16 = vunpack.c.0.s8 %v2170_v48  ;;  %vm914_vm11 = vcmp.ge.f32.partialorder %v2156_v14, 0.0  ;;  %vm907_vm12 = vcmp.ge.f32.partialorder %v2159_v22, 0.0 }
 0x1e0   : > { %v2168_v62 = vadd.f32 %v2066_v17, %v802_v56  ;;  %v928_v17 = vmul.f32 0.01, %v896_v30  ;;  %v2218_v48 = vsub.s32 %v1020_v16, %v2162_v54 }
 0x1e1   : > { %v752_v36 = vpop.permute.xlu0 %751 }
 0x1e2   : > { %v795_v5 = vadd.f32 %v752_v36, %v666_v57  ;;  %v944_v2 = vsel %vm912_vm4, %v896_v30, %v928_v17  ;;  %v922_v30 = vmul.f32 0.01, %v2153_v28  ;;  %v931_v50 = vmul.f32 0.01, %v2168_v62 }
 0x1e3   : > { %vm915_vm13 = vcmp.ge.f32.partialorder %v2168_v62, 0.0  ;;  %v851_v36 = vsel %vm831_vm2, %v848_v41, %v850_v21 }
 0x1e4   : > { %v892_v44 = vadd.f32 %v2081_v8, %v795_v5  ;;  %v2191_v8 = vsel %vm905_vm5, %v889_v46, %v921_v6  ;;  %v930_v46 = vmul.f32 0.01, %v2156_v14  ;;  %v2231_v12 = vsel %vm915_vm13, %v2168_v62, %v931_v50 }
 0x1e5   : > { %v768_v23 = vpop.permute.xlu0 %767  ;;  %v754_v31 = vpop.permute.xlu1 %753 }
 0x1e6   : > { %vm908_vm6 = vcmp.ge.f32.partialorder %v892_v44, 0.0  ;;  %v924_v19 = vmul.f32 0.01, %v892_v44  ;;  %v803_v37 = vadd.f32 %v768_v23, %v674_v60  ;;  %v796_v32 = vadd.f32 %v754_v31, %v667_v24 }
 0x1e7   : > { %v946_v29 = vsel %vm914_vm11, %v2156_v14, %v930_v46 }
 0x1e8   : > { %v940_v25 = vsel %vm908_vm6, %v892_v44, %v924_v19  ;;  %v900_v33 = vadd.f32 %v2084_v9, %v803_v37  ;;  %v893_v0 = vadd.f32 %v2095_v20, %v796_v32  ;;  %v923_v20 = vmul.f32 0.01, %v2159_v22 }
 0x1e9   : > { %v952_v55 = vcombine.low %v936_v49, %v940_v25  ;;  %v953_v3 = vcombine.high %v936_v49, %v940_v25  ;;  %v770_v13 = vpop.permute.xlu1 %769 }
 0x1ea   : > { %vm916_vm9 = vcmp.ge.f32.partialorder %v900_v33, 0.0  ;;  %v932_v39 = vmul.f32 0.01, %v900_v33  ;;  %vm909_vm10 = vcmp.ge.f32.partialorder %v893_v0, 0.0  ;;  %v925_v11 = vmul.f32 0.01, %v893_v0 }
 0x1eb   : > { %v804_v9 = vadd.f32 %v770_v13, %v675_v61  ;;  %v945_v61 = vsel %vm913_vm7, %v2148_v45, %v929_v26  ;;  %v2228_v41 = vsel %vm907_vm12, %v2159_v22, %v923_v20  ;;  %v960_v54 = vrot.slane %v952_v55, %v2177_v15 }
 0x1ec   : > { %v948_v40 = vsel %vm916_vm9, %v900_v33, %v932_v39  ;;  %v941_v35 = vsel %vm909_vm10, %v893_v0, %v925_v11  ;;  %v967_v14 = vrot.slane %v953_v3, %v2177_v15 }
 0x1ed   : > { %v984_v38 = vcombine.low %v944_v2, %v948_v40  ;;  %v985_v10 = vcombine.high %v944_v2, %v948_v40  ;;  %v1088_v43 = vcombine.low %v2191_v8, %v941_v35  ;;  %v1089_v27 = vcombine.high %v2191_v8, %v941_v35  ;;  %v756_v56 = vpop.permute.xlu0 %755 }
 0x1ee   : > { %v901_v57 = vadd.f32 %v2098_v52, %v804_v9  ;;  %v797_v60 = vadd.f32 %v756_v56, %v668_v42  ;;  %v938_v52 = vsel %vm906_vm8, %v2153_v28, %v922_v30 }
 0x1ef   : > { %v992_v62 = vrot.slane %v984_v38, %v2177_v15  ;;  %v999_v7 = vrot.slane %v985_v10, %v2177_v15  ;;  %v1096_v16 = vrot.slane %v1088_v43, %v2177_v15 }
 0x1f0   : > { %vm917_vm14 = vcmp.ge.f32.partialorder %v901_v57, 0.0  ;;  %v933_v24 = vmul.f32 0.01, %v901_v57  ;;  %v894_v4 = vadd.f32 %v2121_v58, %v797_v60 }
 0x1f1   : > { %v772_v34 = vpop.permute.xlu0 %771  ;;  %v758_v45 = vpop.permute.xlu1 %757 }
 0x1f2   : > { %v949_v5 = vsel %vm917_vm14, %v901_v57, %v933_v24  ;;  %vm910_vm15 = vcmp.ge.f32.partialorder %v894_v4, 0.0  ;;  %v926_v28 = vmul.f32 0.01, %v894_v4  ;;  %v805_v42 = vadd.f32 %v772_v34, %v2174_v1 }
 0x1f3   : > { %v1120_v58 = vcombine.low %v945_v61, %v949_v5  ;;  %v1121_v51 = vcombine.high %v945_v61, %v949_v5  ;;  %v798_v17 = vadd.f32 %v758_v45, %v2187_v18  ;;  %v2243_v18 = vrot.slane %v1089_v27, %v2177_v15 }
 0x1f4   : > { %v942_v22 = vsel %vm910_vm15, %v894_v4, %v926_v28  ;;  %v902_v6 = vadd.f32 %v2126_v59, %v805_v42 }
 0x1f5   : > { %v968_v44 = vcombine.low %v938_v52, %v942_v22  ;;  %v969_v21 = vcombine.high %v938_v52, %v942_v22  ;;  %v895_v23 = vadd.f32 %v851_v36, %v798_v17  ;;  %v774_v31 = vpop.permute.xlu1 %773  ;;  %v1128_v32 = vrot.slane %v1120_v58, %v2177_v15 }
 0x1f6   : > { %vm918_vm1 = vcmp.ge.f32.partialorder %v902_v6, 0.0  ;;  %v934_v1 = vmul.f32 0.01, %v902_v6  ;;  %v806_v19 = vadd.f32 %v774_v31, %v2184_v47  ;;  %v1135_v8 = vrot.slane %v1121_v51, %v2177_v15 }
 0x1f7   : > { %vm911_vm2 = vcmp.ge.f32.partialorder %v895_v23, 0.0  ;;  %v927_v37 = vmul.f32 0.01, %v895_v23  ;;  %v976_v59 = vrot.slane %v968_v44, %v2177_v15  ;;  %v983_v2 = vrot.slane %v969_v21, %v2177_v15 }
 0x1f8   : > { %v950_v53 = vsel %vm918_vm1, %v902_v6, %v934_v1  ;;  %v903_v49 = vadd.f32 %v871_v63, %v806_v19 }
 0x1f9   : > { %v1000_v25 = vcombine.low %v946_v29, %v950_v53  ;;  %v1001_v33 = vcombine.high %v946_v29, %v950_v53  ;;  %v943_v0 = vsel %vm911_vm2, %v895_v23, %v927_v37  ;;  %v1016_v26 = vcombine.low %v960_v54, %v976_v59 }
 0x1fa   : > { %v1104_v47 = vcombine.low %v2228_v41, %v943_v0  ;;  %v1105_v55 = vcombine.high %v2228_v41, %v943_v0  ;;  %vm919_vm3 = vcmp.ge.f32.partialorder %v903_v49, 0.0  ;;  %v935_v3 = vmul.f32 0.01, %v903_v49 }
 0x1fb   : > { %v1008_v13 = vrot.slane %v1000_v25, %v2177_v15  ;;  %v2253_v39 = vrot.slane %v1016_v26, %v2218_v48  ;;  %v1017_v11 = vcombine.high %v960_v54, %v976_v59  ;;  %v1015_v30 = vrot.slane %v1001_v33, %v2177_v15 }
 0x1fc   : > { %v951_v46 = vsel %vm919_vm3, %v903_v49, %v935_v3  ;;  %v1032_v9 = vcombine.low %v967_v14, %v983_v2  ;;  %v1033_v20 = vcombine.high %v967_v14, %v983_v2  ;;  %v1112_v50 = vrot.slane %v1104_v47, %v2177_v15 }
 0x1fd   : > { %v1136_v40 = vcombine.low %v2231_v12, %v951_v46  ;;  %v1137_v35 = vcombine.high %v2231_v12, %v951_v46  ;;  %v1048_v38 = vcombine.low %v992_v62, %v1008_v13  ;;  %v2260_v10 = vrot.slane %v1017_v11, %v2218_v48 }
 0x1fe   : > { %v1049_v43 = vcombine.high %v992_v62, %v1008_v13  ;;  %v2263_v27 = vrot.slane %v1032_v9, %v2218_v48  ;;  %v1064_v56 = vcombine.low %v999_v7, %v1015_v30  ;;  %v2266_v57 = vrot.slane %v1033_v20, %v2218_v48 }
 0x1ff   : > { %v1056_v60 = vrot.slane %v1048_v38, %v2218_v48  ;;  %v1065_v61 = vcombine.high %v999_v7, %v1015_v30  ;;  %v1144_v36 = vrot.slane %v1136_v40, %v2177_v15  ;;  %v1153_v63 = vcombine.high %v1096_v16, %v1112_v50 }
 0x200   : > { %v1063_v52 = vrot.slane %v1049_v43, %v2218_v48  ;;  %v1072_v24 = vrot.slane %v1064_v56, %v2218_v48  ;;  %v1152_v4 = vcombine.low %v1096_v16, %v1112_v50  ;;  %v1119_v29 = vrot.slane %v1105_v55, %v2177_v15 }
 0x201   : > { %v1081_v41 = vcombine.high %v2253_v39, %v1056_v60  ;;  %v1079_v12 = vrot.slane %v1065_v61, %v2218_v48  ;;  %v1167_v34 = vrot.slane %v1153_v63, %v2218_v48  ;;  %v1185_v45 = vcombine.high %v1128_v32, %v1144_v36 }
 0x202   : > { %v1083_v54 = vcombine.high %v2260_v10, %v1063_v52  ;;  %v1085_v5 = vcombine.high %v2263_v27, %v1072_v24  ;;  %v1160_v28 = vrot.slane %v1152_v4, %v2218_v48  ;;  %v1184_v42 = vcombine.low %v1128_v32, %v1144_v36 }
 0x203   : > { %1225 = vrot.lane.b32.xlu0 %v1081_v41, %s1590_s29  ;;  %v1087_v58 = vcombine.high %v2266_v57, %v1079_v12  ;;  %v1199_v51 = vrot.slane %v1185_v45, %v2218_v48  ;;  %v1151_v17 = vrot.slane %v1137_v35, %v2177_v15  ;;  %v1169_v14 = vcombine.high %v2243_v18, %v1119_v29 }
 0x204   : > { %1229 = vrot.lane.b32.xlu1 %v1083_v54, %s1590_s29  ;;  %v1192_v22 = vrot.slane %v1184_v42, %v2218_v48  ;;  %v1168_v6 = vcombine.low %v2243_v18, %v1119_v29  ;;  %v1080_v62 = vcombine.low %v2253_v39, %v1056_v60  ;;  %v1082_v7 = vcombine.low %v2260_v10, %v1063_v52 }
 0x205   : > { %v1219_v44 = vcombine.high %v1167_v34, %v1199_v51  ;;  %v1183_v21 = vrot.slane %v1169_v14, %v2218_v48  ;;  %v1201_v23 = vcombine.high %v1135_v8, %v1151_v17  ;;  %v1200_v31 = vcombine.low %v1135_v8, %v1151_v17 }
 0x206   : > { %v1217_v16 = vcombine.high %v1160_v28, %v1192_v22  ;;  %v1176_v15 = vrot.slane %v1168_v6, %v2218_v48  ;;  %v1084_v1 = vcombine.low %v2263_v27, %v1072_v24  ;;  %v1086_v19 = vcombine.low %v2266_v57, %v1079_v12 }
 0x207   : > { %1233 = vrot.lane.b32.xlu0 %v1085_v5, %s1590_s29  ;;  %v1215_v18 = vrot.slane %v1201_v23, %v2218_v48  ;;  %v1208_v37 = vrot.slane %v1200_v31, %v2218_v48  ;;  %v1218_v59 = vcombine.low %v1167_v34, %v1199_v51  ;;  %v1216_v32 = vcombine.low %v1160_v28, %v1192_v22 }
 0x208   : > { %1237 = vrot.lane.b32.xlu1 %v1087_v58, %s1590_s29 }
 0x209   : > { %v1223_v53 = vcombine.high %v1183_v21, %v1215_v18  ;;  %v1221_v49 = vcombine.high %v1176_v15, %v1208_v37  ;;  %v1222_v2 = vcombine.low %v1183_v21, %v1215_v18  ;;  %v1220_v8 = vcombine.low %v1176_v15, %v1208_v37 }
 0x20b   : > { %1241 = vrot.lane.b32.xlu0 %v1217_v16, %s1590_s29 }
 0x20c   : > { %1245 = vrot.lane.b32.xlu1 %v1219_v44, %s1590_s29 }
 0x20f   : > { %1249 = vrot.lane.b32.xlu0 %v1221_v49, %s1590_s29 }
 0x210   : > { %1253 = vrot.lane.b32.xlu1 %v1223_v53, %s1590_s29 }
 0x275   : > { %v1226_v48 = vpop.permute.xlu0 %1225 }
 0x276   : > { %v1256_v25 = vsel %vm322_vm0, %v1080_v62, %v1226_v48  ;;  %v1230_v33 = vpop.permute.xlu1 %1229 }
 0x277   : > { %1264 = vst [vmem:[%s192_s10] sm:$0xff] %v1256_v25  ;;  %v1257_v0 = vsel %vm322_vm0, %v1082_v7, %v1230_v33 }
 0x278   : > { %1265 = vst [vmem:[%s192_s10 + $0x8] sm:$0xff] %v1257_v0 }
 0x279   : > { %v1234_v26 = vpop.permute.xlu0 %1233 }
 0x27a   : > { %v1258_v47 = vsel %vm322_vm0, %v1084_v1, %v1234_v26  ;;  %v1238_v55 = vpop.permute.xlu1 %1237 }
 0x27b   : > { %1266 = vst [vmem:[%s192_s10 + $0x10] sm:$0xff] %v1258_v47  ;;  %v1259_v3 = vsel %vm322_vm0, %v1086_v19, %v1238_v55 }
 0x27c   : > { %1267 = vst [vmem:[%s192_s10 + $0x18] sm:$0xff] %v1259_v3 }
 0x27d   : > { %v1242_v13 = vpop.permute.xlu0 %1241 }
 0x27e   : > { %v1246_v39 = vpop.permute.xlu1 %1245  ;;  %v1260_v11 = vsel %vm322_vm0, %v1216_v32, %v1242_v13 }
 0x27f   : > { %v1261_v30 = vsel %vm322_vm0, %v1218_v59, %v1246_v39  ;;  %1268 = vst [vmem:[%s192_s10 + $0x20] sm:$0xff] %v1260_v11 }
 0x280   : > { %1269 = vst [vmem:[%s192_s10 + $0x28] sm:$0xff] %v1261_v30 }
 0x281   : > { %v1250_v46 = vpop.permute.xlu0 %1249 }
 0x282   : > { %v1254_v9 = vpop.permute.xlu1 %1253  ;;  %v1262_v20 = vsel %vm322_vm0, %v1220_v8, %v1250_v46 }
 0x283   : > { %v1263_v50 = vsel %vm322_vm0, %v1222_v2, %v1254_v9  ;;  %1270 = vst [vmem:[%s192_s10 + $0x30] sm:$0xff] %v1262_v20 }
 0x284   : > { %1271 = vst [vmem:[%s192_s10 + $0x38] sm:$0xff] %v1263_v50 }
 0x285 PF: > { %s13_s16 = sadd.s32 1, %s1588_s16   ;;  %s2334_s12 = smov %s1580_s14 }
 0x286   : > { %p10_p7 = scmp.ge.s32.totalorder %s13_s16, 6   ;;  %s2335_s13 = smov %s1584_s15 }
 0x287   : > { %s2336_s14 = smov %s2339_s17  ;;  %s2337_s15 = smov %s2343_s18 }
 0x288   :  { %12 = sbr.rel (!%p10_p7) target bundleno = 3 (0x3), region = 63 }

</bundles_post_ra>
